<compile_context>
chip_gen: v7x
topology: tpu7x:2x2x1
jax: 0.10.0
libtpu: 0.0.40
codegen_flags: <defaults>
</compile_context>

<pallas_src>
import jax
import jax.numpy as jnp
from jax.experimental import pallas as pl
from jax.experimental.pallas import tpu as pltpu


def _round_up(n, m):
    return ((n + m - 1) // m) * m


def _cdiv(a, b):
    return (a + b - 1) // b


def mlp_kernel(x_ref, w1_ref, b1_ref, w2_ref, b2_ref, o_ref):
    # fc1 (MXU) with BN/bias pre-folded into w1/b1, then bias+ReLU (VPU).
    h = jnp.dot(x_ref[...], w1_ref[...], preferred_element_type=jnp.float32)
    h = jnp.maximum(h + b1_ref[...], 0.0)
    # fc2 (MXU) — output is lane-dense (O padded to a multiple of 128).
    y = jnp.dot(h, w2_ref[...], preferred_element_type=jnp.float32) + b2_ref[...]
    o_ref[...] = y.astype(o_ref.dtype)


def prepare_params(params, eps=1e-5):
    """One-time (cacheable) fold of BatchNorm1d(eval) into fc1 + lane padding.

    Call once per set of weights; reuse the result across forward calls so the
    hot path contains no fold / pad ops.
    """
    w1, b1 = params["w1"], params["b1"]
    gamma, beta = params["gamma"], params["beta"]
    run_mean, run_var = params["run_mean"], params["run_var"]
    w2, b2 = params["w2"], params["b2"]

    K, H = w1.shape
    O = w2.shape[1]

    # (x@W1 + b1 - mean) * gamma/sqrt(var+eps) + beta
    #   = x @ (W1 * scale) + ((b1 - mean) * scale + beta)
    inv_std = jax.lax.rsqrt(run_var + eps)
    scale = gamma * inv_std                              # (H,)
    w1f = (w1 * scale[None, :]).astype(jnp.float32)      # (K, H)
    b1f = ((b1 - run_mean) * scale + beta).astype(jnp.float32)

    # Pad only H and O to lane width (128); K stays unpadded (full-dim block).
    H_pad = _round_up(H, 128)
    O_pad = _round_up(O, 128)

    w1_p = jnp.zeros((K, H_pad), jnp.float32).at[:, :H].set(w1f)
    b1_p = jnp.zeros((1, H_pad), jnp.float32).at[0, :H].set(b1f)
    w2_p = jnp.zeros((H_pad, O_pad), jnp.float32).at[:H, :O].set(
        w2.astype(jnp.float32))
    b2_p = jnp.zeros((1, O_pad), jnp.float32).at[0, :O].set(
        b2.astype(jnp.float32))

    return {
        "w1": w1_p, "b1": b1_p, "w2": w2_p, "b2": b2_p,
        "in_dim": K, "hidden_pad": H_pad, "out_dim": O, "out_pad": O_pad,
    }


def _choose_batch_tiling(B):
    """Pick (B_pad, TM) so blocks satisfy the (8,128) rule and, when possible,
    the grid has >= 2 'parallel' steps (v7x dual-TC) with large tiles."""
    if B < 16:
        # Single grid step; block == full array dims needs no padding.
        return B, B
    B8 = _round_up(B, 8)
    tm = min(512, _round_up(_cdiv(B8, 2), 8))
    return _round_up(B8, tm), tm


def mlp_classifier_forward(x, prepared):
    """Hot path: (optional) pad x over batch -> pallas_call -> slice."""
    w1_p, b1_p = prepared["w1"], prepared["b1"]
    w2_p, b2_p = prepared["w2"], prepared["b2"]
    K = prepared["in_dim"]
    H_pad = prepared["hidden_pad"]
    O, O_pad = prepared["out_dim"], prepared["out_pad"]

    B, Kx = x.shape
    assert Kx == K, f"input dim mismatch: {Kx} vs {K}"

    B_pad, TM = _choose_batch_tiling(B)
    if B_pad != B:
        x_p = jnp.zeros((B_pad, K), x.dtype).at[:B, :].set(x)
    else:
        x_p = x

    grid = (B_pad // TM,)

    flops = 2 * B_pad * (K * H_pad + H_pad * O_pad)
    bytes_accessed = (
        x_p.size * 4 + w1_p.size * 4 + b1_p.size * 4
        + w2_p.size * 4 + b2_p.size * 4 + B_pad * O_pad * 4
    )

    out = pl.pallas_call(
        mlp_kernel,
        out_shape=jax.ShapeDtypeStruct((B_pad, O_pad), x.dtype),
        grid_spec=pltpu.PrefetchScalarGridSpec(
            num_scalar_prefetch=0,
            grid=grid,
            in_specs=[
                pl.BlockSpec((TM, K), lambda i: (i, 0)),        # x tile over batch
                pl.BlockSpec((K, H_pad), lambda i: (0, 0)),     # W1' (grid-invariant)
                pl.BlockSpec((1, H_pad), lambda i: (0, 0)),     # b1' (grid-invariant)
                pl.BlockSpec((H_pad, O_pad), lambda i: (0, 0)), # W2  (grid-invariant)
                pl.BlockSpec((1, O_pad), lambda i: (0, 0)),     # b2  (grid-invariant)
            ],
            out_specs=pl.BlockSpec((TM, O_pad), lambda i: (i, 0)),
        ),
        compiler_params=pltpu.CompilerParams(
            dimension_semantics=("parallel",),
            vmem_limit_bytes=32 << 20,
        ),
        cost_estimate=pl.CostEstimate(
            flops=flops, transcendentals=0, bytes_accessed=bytes_accessed
        ),
    )(x_p, w1_p, b1_p, w2_p, b2_p)

    # Padded rows (if any) contain relu(b1')@W2+b2 garbage; slice them off.
    return out[:B, :O]


def init_params(key, input_dim, hidden_dim, output_dim):
    k1, k2, k3, k4, k5, k6 = jax.random.split(key, 6)
    return {
        "w1": (jax.random.normal(k1, (input_dim, hidden_dim), jnp.float32)
               * (1.0 / jnp.sqrt(input_dim))),
        "b1": jax.random.normal(k2, (hidden_dim,), jnp.float32) * 0.01,
        "gamma": 1.0 + 0.1 * jax.random.normal(k3, (hidden_dim,), jnp.float32),
        "beta": 0.1 * jax.random.normal(k4, (hidden_dim,), jnp.float32),
        "run_mean": 0.05 * jax.random.normal(k5, (hidden_dim,), jnp.float32),
        "run_var": jnp.ones((hidden_dim,), jnp.float32) * 1.2,
        "w2": (jax.random.normal(k6, (hidden_dim, output_dim), jnp.float32)
               * (1.0 / jnp.sqrt(hidden_dim))),
        "b2": jnp.zeros((output_dim,), jnp.float32),
    }


def reference_forward(x, params, eps=1e-5):
    # Pure-JAX reference matching PyTorch eval-mode forward.
    h = x @ params["w1"] + params["b1"]
    h = (h - params["run_mean"]) / jnp.sqrt(params["run_var"] + eps)
    h = h * params["gamma"] + params["beta"]
    h = jnp.maximum(h, 0.0)
    return h @ params["w2"] + params["b2"]


if __name__ == "__main__":
    key = jax.random.PRNGKey(0)
    kx, kp = jax.random.split(key)

    B, INPUT_DIM, HIDDEN_DIM, OUTPUT_DIM = 16, 64, 128, 10
    x = jax.random.normal(kx, (B, INPUT_DIM), jnp.float32)
    params = init_params(kp, INPUT_DIM, HIDDEN_DIM, OUTPUT_DIM)

    # One-time weight preparation (fold + pad), then the lean forward pass.
    prepared = jax.tree_util.tree_map(jax.block_until_ready,
                                      prepare_params(params))

    out = mlp_classifier_forward(x, prepared)
    out = jax.block_until_ready(out)

    ref = reference_forward(x, params)
    assert out.shape == (B, OUTPUT_DIM)
    assert jnp.allclose(out, ref, atol=1e-4, rtol=1e-4)

    print("KERNEL_OK")
</pallas_src>

<mosaic_0001>
module attributes {stable_mosaic.version = 11 : i64} {
  func.func @mlp_kernel(%arg0: i32, %arg1: memref<8x64xf32, #tpu.memory_space<vmem>>, %arg2: memref<64x128xf32, #tpu.memory_space<vmem>>, %arg3: memref<1x128xf32, #tpu.memory_space<vmem>>, %arg4: memref<128x128xf32, #tpu.memory_space<vmem>>, %arg5: memref<1x128xf32, #tpu.memory_space<vmem>>, %arg6: memref<8x128xf32, #tpu.memory_space<vmem>>) attributes {dimension_semantics = [#tpu.dimension_semantics<parallel>], iteration_bounds = array<i64: 2>, scalar_prefetch = 0 : i64, scratch_operands = 0 : i64, tpu.core_type = #tpu.core_type<tc>, window_params = [{transform_indices = @transform_0, window_bounds = array<i64: 8, 64>}, {pipeline_mode = #tpu.pipeline_mode<synchronous>, transform_indices = @transform_1, window_bounds = array<i64: 64, 128>}, {pipeline_mode = #tpu.pipeline_mode<synchronous>, transform_indices = @transform_2, window_bounds = array<i64: 1, 128>}, {pipeline_mode = #tpu.pipeline_mode<synchronous>, transform_indices = @transform_3, window_bounds = array<i64: 128, 128>}, {pipeline_mode = #tpu.pipeline_mode<synchronous>, transform_indices = @transform_4, window_bounds = array<i64: 1, 128>}, {transform_indices = @transform_5, window_bounds = array<i64: 8, 128>}]} {
    %c0 = arith.constant 0 : index
    %c0_0 = arith.constant 0 : index
    %0 = vector.load %arg1[%c0, %c0_0] : memref<8x64xf32, #tpu.memory_space<vmem>>, vector<8x64xf32>
    %c0_1 = arith.constant 0 : index
    %c0_2 = arith.constant 0 : index
    %1 = vector.load %arg2[%c0_1, %c0_2] : memref<64x128xf32, #tpu.memory_space<vmem>>, vector<64x128xf32>
    %cst = arith.constant dense<0.000000e+00> : vector<8x128xf32>
    %2 = tpu.matmul %0, %1, %cst {dimension_numbers = #tpu.dot_dimension_numbers<[1], [0], [0], [1], [0, 0, 1, 1], [], []>} : vector<8x64xf32>, vector<64x128xf32>, vector<8x128xf32> -> vector<8x128xf32>
    %c0_3 = arith.constant 0 : index
    %c0_4 = arith.constant 0 : index
    %3 = vector.load %arg3[%c0_3, %c0_4] : memref<1x128xf32, #tpu.memory_space<vmem>>, vector<1x128xf32>
    %4 = vector.broadcast %3 : vector<1x128xf32> to vector<8x128xf32>
    %5 = arith.addf %2, %4 : vector<8x128xf32>
    %cst_5 = arith.constant 0.000000e+00 : f32
    %6 = vector.broadcast %cst_5 : f32 to vector<8x128xf32>
    %7 = arith.maximumf %5, %6 : vector<8x128xf32>
    %c0_6 = arith.constant 0 : index
    %c0_7 = arith.constant 0 : index
    %8 = vector.load %arg4[%c0_6, %c0_7] : memref<128x128xf32, #tpu.memory_space<vmem>>, vector<128x128xf32>
    %cst_8 = arith.constant dense<0.000000e+00> : vector<8x128xf32>
    %9 = tpu.matmul %7, %8, %cst_8 {dimension_numbers = #tpu.dot_dimension_numbers<[1], [0], [0], [1], [0, 0, 1, 1], [], []>} : vector<8x128xf32>, vector<128x128xf32>, vector<8x128xf32> -> vector<8x128xf32>
    %c0_9 = arith.constant 0 : index
    %c0_10 = arith.constant 0 : index
    %10 = vector.load %arg5[%c0_9, %c0_10] : memref<1x128xf32, #tpu.memory_space<vmem>>, vector<1x128xf32>
    %11 = vector.broadcast %10 : vector<1x128xf32> to vector<8x128xf32>
    %12 = arith.addf %9, %11 : vector<8x128xf32>
    %c0_11 = arith.constant 0 : index
    %c0_12 = arith.constant 0 : index
    %13 = vector.load %arg6[%c0_11, %c0_12] : memref<8x128xf32, #tpu.memory_space<vmem>>, vector<8x128xf32>
    tpu.vector_store %arg6[%c0_11, %c0_12], %12 {strides = array<i32>} : memref<8x128xf32, #tpu.memory_space<vmem>>, vector<8x128xf32>,
    return
  }
  func.func @transform_0(%arg0: i32) -> (i32, i32) {
    %c0_i32 = arith.constant 0 : i32
    %c0_i32_0 = arith.constant 0 : i32
    return %arg0, %c0_i32 : i32, i32
  }
  func.func @transform_1(%arg0: i32) -> (i32, i32) {
    %c0_i32 = arith.constant 0 : i32
    %c0_i32_0 = arith.constant 0 : i32
    %c0_i32_1 = arith.constant 0 : i32
    return %c0_i32, %c0_i32_0 : i32, i32
  }
  func.func @transform_2(%arg0: i32) -> (i32, i32) {
    %c0_i32 = arith.constant 0 : i32
    %c0_i32_0 = arith.constant 0 : i32
    %c0_i32_1 = arith.constant 0 : i32
    return %c0_i32, %c0_i32_0 : i32, i32
  }
  func.func @transform_3(%arg0: i32) -> (i32, i32) {
    %c0_i32 = arith.constant 0 : i32
    %c0_i32_0 = arith.constant 0 : i32
    %c0_i32_1 = arith.constant 0 : i32
    return %c0_i32, %c0_i32_0 : i32, i32
  }
  func.func @transform_4(%arg0: i32) -> (i32, i32) {
    %c0_i32 = arith.constant 0 : i32
    %c0_i32_0 = arith.constant 0 : i32
    %c0_i32_1 = arith.constant 0 : i32
    return %c0_i32, %c0_i32_0 : i32, i32
  }
  func.func @transform_5(%arg0: i32) -> (i32, i32) {
    %c0_i32 = arith.constant 0 : i32
    %c0_i32_0 = arith.constant 0 : i32
    return %arg0, %c0_i32 : i32, i32
  }
}

</mosaic_0001>

<bundles_post_ra>
// kernel: tpu_custom_call.1
= control target key start
LH: loop header
LB: loop body
LE: loop exit
PB: predicated region body
PF: predicated region fallthrough
CT: control target
= control target key end

     0   :  { %10 = vsyncpa [#allocation3], 0  ;;  %s1203_s0 = inlined_call_operand.hbm [shape: f32[16,64], index: 0, kind: input, shape index: {}]   ;;  %s1204_s1 = inlined_call_operand.hbm [shape: f32[64,128], index: 1, kind: input, shape index: {}]   ;;  %s1205_s2 = inlined_call_operand.vmem [shape: f32[1,128], index: 2, kind: input, shape index: {}]   ;;  %s1206_s3 = inlined_call_operand.hbm [shape: f32[128,128], index: 3, kind: input, shape index: {}]   ;;  %s1207_s4 = inlined_call_operand.vmem [shape: f32[1,128], index: 4, kind: input, shape index: {}]   ;;  %s1208_s5 = inlined_call_operand.hbm [shape: f32[16,128], index: 5, kind: output, shape index: {}]  }
   0x1   :  { %12 = vsyncpa [#allocation3 + $0x1], 0 }
   0x2   :  { %13 = vsyncpa [#allocation6], 0 }
   0x3   :  { %14 = vsyncpa [#allocation4], 0 }
   0x4   :  { %16 = vsyncpa [#allocation4 + $0x1], 0  ;;  %s961_s18 = smov 0   ;;  %s963_s19 = smov 0  }
   0x5   :  { %s965_s20 = smov 0   ;;  %s967_s21 = smov 0  }
   0x6 LB: > { %s982_s22 = sadd.s32 4294967295, %s920_s21   ;;  %s557_s23 = sadd.s32 4294967294, %s920_s21   ;;  %s920_s21 = sphi %s967_s21, %s1228_s21   ;;  %s916_s20 = sphi %s965_s20, %s1227_s20   ;;  %s912_s19 = sphi %s963_s19, %s1226_s19   ;;  %s908_s18 = sphi %s961_s18, %s1225_s18  }
   0x7   : > { %p42_p0 = scmp.ne.s32.totalorder %s912_s19, %s908_s18  ;;  %p1209_p1 = scmp.eq.s32.totalorder %s982_s22, 0 }
   0x8   : > { %p156_p3 = scmp.eq.s32.totalorder %s557_s23, 1  ;;  %p558_p5 = scmp.ge.s32.totalorder %s920_s21, 1 }
   0x9   : > { %p991_p4 = por %p1209_p1, %p42_p0  ;;  %p163_p7 = scmp.lt.s32.totalorder %s920_s21, 3 }
   0xa   : > { %p996_p6 = por %p156_p3, %p42_p0  ;;  %s922_s27 = smov [#allocation5]  }
   0xb   : > { %s1212_s24 = scalar_select %p991_p4, 1, 0 }
   0xc   : > { %s1213_s25 = scalar_select %p996_p6, 1, 0 }
   0xd   : > { %p1001_p8 = pnand %p558_p5, %p163_p7  ;;  %s175_s28 = sshll.u32 %s922_s27, 4  ;;  %s1005_s28 = int_to_ptr.vmem [resolvable:$true] %s175_s28 }
   0xe   : > { %s923_s30 = smov [#allocation7]   ;;  %s764_s9 = scalar_lea.hbm %s1204_s1, 1024 }
   0xf   : > { %p704_p9 = pneg %p1001_p8  ;;  %s191_s6 = sshll.u32 %s923_s30, 4  ;;  %s1016_s6 = int_to_ptr.vmem [resolvable:$true] %s191_s6 }
  0x10   : > { %p765_p12 = scmp.ne.s32.totalorder %s1204_s1, %s764_s9  ;;  %p771_p5 = scmp.lt.u32.totalorder %s764_s9, %s1204_s1 }
  0x11   : > { %p1012_p11 = pnand %p704_p9, %p1209_p1 }
  0x13   : > { %p766_p13 = pneg %p1012_p11 }
  0x15   : > { %p767_p0 = pnand %p766_p13, %p765_p12 }
  0x17   : > { %p768_p3 = pneg %p767_p0 }
  0x19   : > { %p773_p7 = pnand %p771_p5, %p768_p3 }
  0x1b   : > { %776 = shalt.err (!%p773_p7)
}
  0x1c   : > { %s777_s14 = scalar_lea.vmem %s1005_s28, 1024  ;;  %p785_p2 = scmp.lt.s32.totalorder %s1005_s28, %s1005_s28 }
  0x1d   : > { %p778_p9 = scmp.ne.s32.totalorder %s1005_s28, %s777_s14  ;;  %p786_p12 = scmp.lt.s32.totalorder %s777_s14, %s777_s14 }
  0x1f   : > { %p780_p10 = pnand %p778_p9, %p766_p13  ;;  %p787_p0 = por %p786_p12, %p785_p2 }
  0x21   : > { %p781_p1 = pneg %p780_p10 }
  0x23   : > { %p788_p6 = pnand %p787_p0, %p781_p1 }
  0x25   : > { %791 = shalt.err (!%p788_p6)
}
  0x26   : > { %s924_s15 = smov 128   ;;  %s925_s16 = smov 8  }
  0x27   : > { %707 = dma.hbm_to_vmem [thread:$0]  (!%p1012_p11), %s1204_s1, 1024, %s1005_s28, [#allocation6], %s924_s15, %s924_s15, %s925_s16  }
  0x28   : > { %s792_s7 = scalar_lea.hbm %s1206_s3, 2048 }
  0x29   : > { %p793_p2 = scmp.ne.s32.totalorder %s1206_s3, %s792_s7  ;;  %p799_p10 = scmp.lt.u32.totalorder %s792_s7, %s1206_s3 }
  0x2b   : > { %p795_p1 = pnand %p793_p2, %p766_p13 }
  0x2d   : > { %p796_p6 = pneg %p795_p1 }
  0x2f   : > { %p801_p3 = pnand %p799_p10, %p796_p6 }
  0x31   : > { %804 = shalt.err (!%p801_p3)
}
  0x32   : > { %s805_s28 = scalar_lea.vmem %s1016_s6, 2048  ;;  %p813_p12 = scmp.lt.s32.totalorder %s1016_s6, %s1016_s6 }
  0x33   : > { %p806_p5 = scmp.ne.s32.totalorder %s1016_s6, %s805_s28  ;;  %p814_p0 = scmp.lt.s32.totalorder %s805_s28, %s805_s28 }
  0x35   : > { %p808_p7 = pnand %p806_p5, %p766_p13  ;;  %p815_p2 = por %p814_p0, %p813_p12 }
  0x37   : > { %p809_p9 = pneg %p808_p7 }
  0x39   : > { %p816_p1 = pnand %p815_p2, %p809_p9 }
  0x3b   : > { %819 = shalt.err (!%p816_p1)
}
  0x3c   : > { %710 = dma.hbm_to_vmem [thread:$0]  (!%p1012_p11), %s1206_s3, 2048, %s1016_s6, [#allocation6], %s924_s15, %s924_s15, %s925_s16  }
  0x3d   : > { %s1071_s14 = sadd.s32 1, %s920_s21   ;;  %s29_s29 = sadd.s32 1, %s916_s20 }
  0x3e   : > { %s26_s17 = ssub.s32 %s920_s21, %s1071_s14  ;;  %p36_p13 = scmp.ne.s32.totalorder %s916_s20, %s912_s19 }
  0x3f   : > { %p27_p6 = scmp.eq.s32.totalorder %s26_s17, 0  ;;  %p37_p10 = scmp.eq.s32.totalorder %s920_s21, 0 }
  0x40   : > { %p1216_p3 = scmp.eq.s32.totalorder %s982_s22, 1  ;;  %p721_p7 = scmp.lt.s32.totalorder %s920_s21, 2 }
  0x41   : > { %s1087_s27 = scalar_select %p27_p6, %s916_s20, %s29_s29  }
  0x42   : > { %p1081_p5 = por %p1216_p3, %p36_p13  ;;  %p38_p9 = por %p37_p10, %p36_p13 }
  0x43   : > { %s208_s30 = sand.u32 1, %s916_s20   ;;  %s563_s6 = sshll.u32 %s920_s21, 7 }
  0x44   : > { %s1217_s23 = scalar_select %p1081_p5, 1, 0 }
  0x45   : > { %s562_s7 = sshll.u32 %s208_s30, 3  ;;  %s1094_s8 = scalar_lea.hbm %s1203_s0, %s563_s6 }
  0x46   : > { %s212_s9 = scalar_lea.vmem [#allocation2], %s562_s7  ;;  %p1098_p11 = pnand %p721_p7, %p38_p9 }
  0x47   : > { %s219_s10 = sshll.u32 %s212_s9, 4  ;;  %s209_s28 = scalar_lea.sflag [#allocation3], %s208_s30  ;;  %s1096_s10 = int_to_ptr.vmem [resolvable:$true] %s219_s10 }
  0x48   : > { %s820_s12 = scalar_lea.hbm %s1094_s8, 128  ;;  %p822_p0 = pneg %p1098_p11 }
  0x49   : > { %p821_p12 = scmp.ne.s32.totalorder %s1094_s8, %s820_s12  ;;  %s825_s17 = scalar_lea.hbm %s1203_s0, 256 }
  0x4a   : > { %p826_p13 = scmp.lt.u32.totalorder %s1094_s8, %s1203_s0  ;;  %p827_p6 = scmp.lt.u32.totalorder %s825_s17, %s820_s12 }
  0x4b   : > { %p823_p2 = pnand %p822_p0, %p821_p12  ;;  %p829_p3 = scmp.lt.u32.totalorder %s820_s12, %s1094_s8 }
  0x4c   : > { %p828_p10 = por %p827_p6, %p826_p13 }
  0x4d   : > { %p824_p1 = pneg %p823_p2 }
  0x4e   : > { %p830_p7 = por %p829_p3, %p828_p10 }
  0x50   : > { %p831_p9 = pnand %p830_p7, %p824_p1 }
  0x52   : > { %834 = shalt.err (!%p831_p9)
}
  0x53   : > { %s835_s30 = scalar_lea.vmem %s1096_s10, 128  ;;  %s926_s15 = smov [#allocation2]  }
  0x54   : > { %p836_p12 = scmp.ne.s32.totalorder %s1096_s10, %s835_s30  ;;  %s840_s16 = sshll.u32 %s926_s15, 4  ;;  %s841_s16 = int_to_ptr.vmem [resolvable:$false] %s840_s16 }
  0x55   : > { %s842_s9 = scalar_lea.vmem %s841_s16, 256  ;;  %p843_p4 = scmp.lt.s32.totalorder %s1096_s10, %s841_s16 }
  0x56   : > { %p838_p2 = pnand %p836_p12, %p822_p0  ;;  %p844_p13 = scmp.lt.s32.totalorder %s842_s9, %s835_s30 }
  0x58   : > { %p839_p5 = pneg %p838_p2  ;;  %p845_p6 = por %p844_p13, %p843_p4 }
  0x5a   : > { %p846_p10 = pnand %p845_p6, %p839_p5 }
  0x5c   : > { %849 = shalt.err (!%p846_p10)
}
  0x5d   : > { %714 = dma.hbm_to_vmem [thread:$0]  (!%p1098_p11), %s1094_s8, 128, %s1096_s10, %s209_s28  }
  0x5e   : > { %228 = sbr.rel (%p1001_p8) target bundleno = 567 (0x237), region = 40  ;;  %s1130_s12 = sand.u32 (!%p1001_p8), 1, %s912_s19  }
  0x5f   : > { %s565_s13 = sshll.u32 (!%p1001_p8), %s1130_s12, 3  ;;  %s231_s29 = scalar_lea.sflag (!%p1001_p8), [#allocation3], %s1130_s12 }
  0x60   : > { %s1136_s17 = scalar_lea.vmem (!%p1001_p8), [#allocation2], %s565_s13  ;;  %p1219_p4 = scmp.ne.s32.totalorder (!%p1001_p8), %s1212_s24, 0 }
  0x65   : > { %895 = dma.done.wait (%p1219_p4), %s231_s29, 128  }
  0x66   : > { %897 = vsyncadd (%p1219_p4), %s231_s29, 4294967168  ;;  %p1220_p5 = scmp.eq.s32.totalorder %s982_s22, 0 }
  0x68   : > { %899 = dma.done.wait (%p1220_p5), [#allocation6], 3072   ;;  %p1221_p8 = pmov %p1220_p5 }
  0x69   : > { %v927_v0 = vmov 0.0|0.0   ;;  %vm928_vm0 = vmmov 0   ;;  %v929_v1 = vmov 0.0   ;;  %v270_v2 = vld [vmem:[#allocation5] sm:$0xff]  ;;  %v271_v3 = vld [vmem:[#allocation5 + $0x8] sm:$0xff]  ;;  %v272_v4 = vld [vmem:[#allocation5 + $0x10] sm:$0xff] }
  0x6a   : > { %901 = vsyncadd (%p1221_p8), [#allocation6], 4294964224  ;;  %656 = vmatprep.subr.bf16.mxu0 %v927_v0  ;;  %618 = vmatprep.mubr.msk.f32.mxu0 %vm928_vm0, %v929_v1  ;;  %v657_v5 = vpack.c.bf16 %v271_v3, %v270_v2  ;;  %v273_v6 = vld [vmem:[#allocation5 + $0x18] sm:$0xff]  ;;  %v360_v8 = vld [vmem:[#allocation7] sm:$0xff]  ;;  %vm285_vm1 = vcmask 523264   ;;  %s573_s11 = sshll.u32 %s982_s22, 7 }
  0x6b   : > { %668 = vmatprep.subr.bf16.mxu1 %v927_v0  ;;  %653 = vmatprep.mubr.msk.f32.mxu1 %vm928_vm0, %v929_v1  ;;  %v660_v7 = vpack.c.bf16 %v273_v6, %v272_v4  ;;  %v361_v9 = vld [vmem:[#allocation7 + $0x8] sm:$0xff]  ;;  %v362_v10 = vld [vmem:[#allocation7 + $0x10] sm:$0xff]  ;;  %v274_v11 = vld [vmem:[#allocation5 + $0x20] sm:$0xff]  ;;  %s268_s28 = scalar_lea.vmem [#allocation8], %s565_s13  ;;  %s1159_s15 = scalar_lea.hbm %s1208_s5, %s573_s11 }
  0x6c   : > { %658 = vmatpush3.bf16.msra.mxu0 %v657_v5  ;;  %v275_v12 = vld [vmem:[#allocation5 + $0x28] sm:$0xff]  ;;  %v669_v13 = vpack.c.bf16 %v361_v9, %v360_v8  ;;  %v363_v14 = vld [vmem:[#allocation7 + $0x18] sm:$0xff]  ;;  %v364_v17 = vld [vmem:[#allocation7 + $0x20] sm:$0xff]  ;;  %s468_s7 = sshll.u32 %s268_s28, 4  ;;  %s455_s16 = scalar_lea.sflag [#allocation4], %s1130_s12  ;;  %s1161_s7 = int_to_ptr.vmem [resolvable:$true] %s468_s7 }
  0x6d   : > { %659 = vmatprep.subr.bf16.mxu0 %v927_v0  ;;  %v672_v15 = vpack.c.bf16 %v363_v14, %v362_v10  ;;  %v663_v16 = vpack.c.bf16 %v275_v12, %v274_v11  ;;  %v365_v18 = vld [vmem:[#allocation7 + $0x28] sm:$0xff]  ;;  %v276_v19 = vld [vmem:[#allocation5 + $0x30] sm:$0xff]  ;;  %v277_v20 = vld [vmem:[#allocation5 + $0x38] sm:$0xff]  ;;  %s850_s9 = scalar_lea.vmem %s1161_s7, 128  ;;  %p1222_p0 = scmp.ne.s32.totalorder %s1217_s23, 0 }
  0x6e   : > { %670 = vmatpush3.bf16.msra.mxu1 %v669_v13  ;;  %v675_v21 = vpack.c.bf16 %v365_v18, %v364_v17  ;;  %v666_v22 = vpack.c.bf16 %v277_v20, %v276_v19  ;;  %v366_v23 = vld [vmem:[#allocation7 + $0x30] sm:$0xff]  ;;  %v367_v24 = vld [vmem:[#allocation7 + $0x38] sm:$0xff]  ;;  %v368_v27 = vld [vmem:[#allocation7 + $0x40] sm:$0xff]  ;;  %p851_p11 = scmp.ne.s32.totalorder %s1161_s7, %s850_s9  ;;  %s930_s22 = smov [#allocation8]  }
  0x6f   : > { %671 = vmatprep.subr.bf16.mxu1 %v927_v0  ;;  %v678_v25 = vpack.c.bf16 %v367_v24, %v366_v23  ;;  %v269_v26 = vld [vmem:[%s1136_s17] sm:$0xff]  ;;  %v369_v28 = vld [vmem:[#allocation7 + $0x48] sm:$0xff]  ;;  %v372_v33 = vld [vmem:[#allocation7 + $0x60] sm:$0xff]  ;;  %s854_s13 = sshll.u32 %s930_s22, 4  ;;  %s855_s13 = int_to_ptr.vmem [resolvable:$false] %s854_s13 }
  0x70   : > { %661 = vmatpush3.bf16.msra.mxu0 %v660_v7  ;;  %v681_v29 = vpack.c.bf16 %v369_v28, %v368_v27  ;;  %v370_v30 = vld [vmem:[#allocation7 + $0x50] sm:$0xff]  ;;  %v371_v31 = vld [vmem:[#allocation7 + $0x58] sm:$0xff]  ;;  %v373_v34 = vld [vmem:[#allocation7 + $0x68] sm:$0xff]  ;;  %p852_p1 = pnand %p851_p11, %p1222_p0  ;;  %s856_s29 = scalar_lea.vmem %s855_s13, 256 }
  0x71   : > { %662 = vmatprep.subr.bf16.mxu0 %v927_v0  ;;  %v684_v32 = vpack.c.bf16 %v371_v31, %v370_v30  ;;  %v687_v35 = vpack.c.bf16 %v373_v34, %v372_v33  ;;  %v374_v36 = vld [vmem:[#allocation7 + $0x70] sm:$0xff]  ;;  %v375_v37 = vld [vmem:[#allocation7 + $0x78] sm:$0xff]  ;;  %p857_p7 = scmp.lt.s32.totalorder %s1161_s7, %s855_s13  ;;  %p858_p9 = scmp.lt.s32.totalorder %s856_s29, %s850_s9 }
  0x72   : > { %673 = vmatpush3.bf16.msra.mxu1 %v672_v15  ;;  %v690_v38 = vpack.c.bf16 %v375_v37, %v374_v36  ;;  %v569_v39 = vld [vmem:[%s1205_s2] ss:$0 sm:$0xff]  ;;  %p853_p3 = pneg %p852_p1 }
  0x73   : > { %674 = vmatprep.subr.bf16.mxu1 %v927_v0  ;;  %v571_v44 = vld [vmem:[%s1207_s4] ss:$0 sm:$0xff]  ;;  %p859_p12 = por %p858_p9, %p857_p7 }
  0x74   : > { %664 = vmatpush3.bf16.msra.mxu0 %v663_v16 }
  0x75   : > { %665 = vmatprep.subr.bf16.mxu0 %v927_v0  ;;  %p860_p2 = pnand %p859_p12, %p853_p3 }
  0x76   : > { %676 = vmatpush3.bf16.msra.mxu1 %v675_v21 }
  0x77   : > { %677 = vmatprep.subr.bf16.mxu1 %v927_v0 }
  0x78   : > { %667 = vmatpush3.bf16.msra.mxu0 %v666_v22 }
  0x7a   : > { %679 = vmatpush3.bf16.msra.mxu1 %v678_v25 }
  0x7b   : > { %619 = vmatmul.mubr.msk.f32.vlgmr.msra.gmra.mrb[0].mxu0 %vm285_vm1, %v269_v26  ;;  %680 = vmatprep.subr.bf16.mxu1 %v927_v0 }
  0x7e   : > { %682 = vmatpush3.bf16.msra.mxu1 %v681_v29 }
  0x7f   : > { %683 = vmatprep.subr.bf16.mxu1 %v927_v0 }
  0x82   : > { %685 = vmatpush3.bf16.msra.mxu1 %v684_v32 }
  0x83   : > { %686 = vmatprep.subr.bf16.mxu1 %v927_v0 }
  0x86   : > { %688 = vmatpush3.bf16.msra.mxu1 %v687_v35 }
  0x87   : > { %689 = vmatprep.subr.bf16.mxu1 %v927_v0 }
  0x8a   : > { %691 = vmatpush3.bf16.msra.mxu1 %v690_v38 }
 0x14e   : > { %v355_v40 = vpop.f32.mrb[0].mxu0 }
 0x14f   : > { %v356_v41 = vadd.f32 %v569_v39, %v355_v40  ;;  %v620_v42 = vpop.f32.mrb[1].mxu0 }
 0x151   : > { %v359_v43 = vmax.f32 %v356_v41, 0.0 }
 0x153   : > { %654 = vmatmul.mubr.f32.vlgmr.msra.gmra.mrb[0].mxu1 %v359_v43 }
 0x226   : > { %v449_v45 = vpop.f32.mrb[0].mxu1 }
 0x227   : > { %v450_v46 = vadd.f32 %v571_v44, %v449_v45  ;;  %v655_v47 = vpop.f32.mrb[1].mxu1 }
 0x229   : > { %453 = vst [vmem:[%s268_s28] sm:$0xff] %v450_v46 }
 0x22a   : > { %863 = shalt.err (!%p860_p2)
}
 0x22b   : > { %s864_s12 = scalar_lea.hbm %s1159_s15, 128  ;;  %s868_s26 = scalar_lea.hbm %s1208_s5, 256 }
 0x22c   : > { %p865_p13 = scmp.ne.s32.totalorder %s1159_s15, %s864_s12  ;;  %p869_p4 = scmp.lt.u32.totalorder %s1159_s15, %s1208_s5 }
 0x22d   : > { %p870_p5 = scmp.lt.u32.totalorder %s868_s26, %s864_s12  ;;  %p872_p11 = scmp.lt.u32.totalorder %s864_s12, %s1159_s15 }
 0x22e   : > { %p866_p6 = pnand %p865_p13, %p1222_p0 }
 0x22f   : > { %p871_p8 = por %p870_p5, %p869_p4 }
 0x230   : > { %p867_p10 = pneg %p866_p6 }
 0x231   : > { %p873_p1 = por %p872_p11, %p871_p8 }
 0x233   : > { %p874_p3 = pnand %p873_p1, %p867_p10 }
 0x235   : > { %877 = shalt.err (!%p874_p3)
}
 0x236   : > { %702 = dma.vmem_to_hbm [thread:$0]  (%p1222_p0), %s1161_s7, 128, %s1159_s15, %s455_s16  }
 0x237 PF: > { %s480_s11 = sand.u32 1, %s908_s18   ;;  %p1223_p7 = scmp.ne.s32.totalorder %s1213_s25, 0 }
 0x238   : > { %p1224_p9 = scmp.ge.s32.totalorder %s920_s21, 2  ;;  %s481_s28 = scalar_lea.sflag [#allocation4], %s480_s11 }
 0x23a   : > { %p716_p12 = pnand %p1224_p9, %p1223_p7 }
 0x23c   : > { %903 = dma.done.wait (!%p716_p12), %s481_s28, 128  }
 0x23d   : > { %905 = vsyncadd (!%p716_p12), %s481_s28, 4294967168  ;;  %p19_p2 = scmp.ge.s32.totalorder %s1071_s14, 4   ;;  %s1225_s18 = smov %s912_s19 }
 0x23e   : > { %s1226_s19 = smov %s916_s20  ;;  %s1227_s20 = smov %s1087_s27 }
 0x23f   : > { %s1228_s21 = smov %s1071_s14  ;;  %21 = sbr.rel (!%p19_p2) target bundleno = 6 (0x6), region = 93 }
 0x246   :  { %486 = vsyncpa [#allocation3], 1 }
 0x247   :  { %488 = vsyncpa [#allocation3 + $0x1], 1 }
 0x248   :  { %489 = vsyncpa [#allocation6], 1 }
 0x249   :  { %490 = vsyncpa [#allocation4], 1 }
 0x24a   :  { %492 = vsyncpa [#allocation4 + $0x1], 1 }

</bundles_post_ra>
